<compile_context>
chip_gen: v6e
topology: v6e:2x2x1
jax: 0.10.0
libtpu: 0.0.40
codegen_flags: <defaults>
</compile_context>

<pallas_src>
import math

import jax
import jax.numpy as jnp
from jax.experimental import pallas as pl
from jax.experimental.pallas import tpu as pltpu

THETA = math.log(1.4 / 1.0 + 1.0)  # l = 1


def _gc_block_kernel(x_ref, h0_ref, att_ref, wb_ref, st_ref, o_ref):
    """Single invocation; all operands fully resident in VMEM.

    Layouts:
      x/h0/out : [N, L]      node-major slab, L = lane-padded B*F (128 here)
      att      : [N, N]
      wb       : [2, L, L]   stacked block-diagonal folded weights W1', W2'
      st       : [4, N, L]   stacked BN-eval affine slabs s1, t1, s2, t2
    """
    x = x_ref[...]
    att = att_ref[...]
    w1 = wb_ref[0]
    # h0 only enters gc2 through h0 @ W2'; compute once, reuse for both calls.
    h0w2 = jnp.dot(h0_ref[...], wb_ref[1], preferred_element_type=jnp.float32)

    def gc2(y):
        # NOTE(v6e/v7x): for large N cast att / w1 / y to bf16 here (keeping
        # preferred_element_type=f32) for the single-pass MXU path; kept f32
        # at this toy size so the 1e-4 reference check stays tight and the
        # v5e elementwise path stays pure f32.
        hi = jnp.dot(att, y, preferred_element_type=jnp.float32)
        return jnp.dot(hi, w1, preferred_element_type=jnp.float32) + h0w2

    # (BN-eval + gc2 bias) folded into a per-element affine; tanh on the EUP.
    y = jnp.tanh(gc2(x) * st_ref[0] + st_ref[1])
    y = jnp.tanh(gc2(y) * st_ref[2] + st_ref[3])
    o_ref[...] = (y + x).astype(o_ref.dtype)


def fold_gc_block_params(att, weight, bias,
                         bn1_gamma, bn1_beta, bn1_mean, bn1_var,
                         bn2_gamma, bn2_beta, bn2_mean, bn2_var,
                         *, batch, node_n, in_features, eps=1e-5):
    """One-time constant folding. Call at parameter-load time, NOT per forward."""
    B, N, F = batch, node_n, in_features
    BF = B * F
    L = ((BF + 127) // 128) * 128           # lane-pad to full 128-lane vregs

    c = 0.5 * (1.0 - THETA)
    eye_f = jnp.eye(F, dtype=jnp.float32)
    w1p = THETA * weight[:F, :] + c * eye_f  # theta*W1 + 0.5*(1-theta)*I
    w2p = THETA * weight[F:, :] + c * eye_f  # theta*W2 + 0.5*(1-theta)*I

    # Block-diagonal fold over batch: kron(I_B, W')  -> one [N,L]@[L,L] dot
    # per gc2 matmul, no in-kernel reshape/transpose.  (Guard: grows as
    # (B*F)^2; for larger B use a [B*N, F] row layout / batch grid instead.)
    eye_b = jnp.eye(B, dtype=jnp.float32)
    w1_big = jnp.kron(eye_b, w1p)            # [BF, BF]
    w2_big = jnp.kron(eye_b, w2p)
    pad2 = ((0, L - BF), (0, L - BF))
    wb = jnp.stack([jnp.pad(w1_big, pad2), jnp.pad(w2_big, pad2)])   # [2, L, L]

    def fold_bn(gamma, beta, mean, var):
        inv = gamma / jnp.sqrt(var + eps)                            # [N*F]
        s = inv.reshape(N, F)
        t = (beta - mean * inv).reshape(N, F) + bias[None, :] * s    # bias folded
        # tile over batch along lanes: slab[n, b*F + f] = value[n, f]
        s_slab = jnp.broadcast_to(s[:, None, :], (N, B, F)).reshape(N, BF)
        t_slab = jnp.broadcast_to(t[:, None, :], (N, B, F)).reshape(N, BF)
        padl = ((0, 0), (0, L - BF))
        return jnp.pad(s_slab, padl), jnp.pad(t_slab, padl)

    s1, t1 = fold_bn(bn1_gamma, bn1_beta, bn1_mean, bn1_var)
    s2, t2 = fold_bn(bn2_gamma, bn2_beta, bn2_mean, bn2_var)
    st = jnp.stack([s1, t1, s2, t2])                                 # [4, N, L]

    return att.astype(jnp.float32), wb, st


def gc_block_apply_slab(x_slab, h0_slab, att, wb, st):
    """Slab-in / slab-out forward: keeps the [N, L] layout so stacked GCNII
    layers can chain without per-layer transposes / HBM round trips."""
    N, L = x_slab.shape
    return pl.pallas_call(
        _gc_block_kernel,
        out_shape=jax.ShapeDtypeStruct((N, L), x_slab.dtype),
        in_specs=[pl.BlockSpec(memory_space=pltpu.MemorySpace.VMEM)] * 5,
        out_specs=pl.BlockSpec(memory_space=pltpu.MemorySpace.VMEM),
        input_output_aliases={0: 0},   # output reuses x_slab's buffer
    )(x_slab, h0_slab, att, wb, st)


def gc_block_forward(x, h0, att, wb, st):
    """[B,N,F] convenience wrapper around the slab kernel (layout plumbing only)."""
    B, N, F = x.shape
    BF = B * F
    L = wb.shape[-1]

    def to_slab(a):  # [B,N,F] -> node-major, lane-padded [N, L]
        s = jnp.transpose(a, (1, 0, 2)).reshape(N, BF)
        return jnp.pad(s, ((0, 0), (0, L - BF)))

    out_slab = gc_block_apply_slab(to_slab(x), to_slab(h0), att, wb, st)
    return jnp.transpose(out_slab[:, :BF].reshape(N, B, F), (1, 0, 2))


def gc_block_reference(x, h0, att, weight, bias,
                       bn1_gamma, bn1_beta, bn1_mean, bn1_var,
                       bn2_gamma, bn2_beta, bn2_mean, bn2_var,
                       eps=1e-5):
    """Pure-JAX reference mirroring the PyTorch forward (eval BN, no dropout)."""
    B, N, F = x.shape

    def gc2(y):
        hi = jnp.einsum('nm,bmf->bnf', att, y)
        support = jnp.concatenate([hi, h0], axis=2)
        r = 0.5 * hi + 0.5 * h0
        return THETA * jnp.einsum('bnk,kf->bnf', support, weight) \
            + (1.0 - THETA) * r + bias

    def bn(y, gamma, beta, mean, var):
        yf = y.reshape(B, -1)
        yf = (yf - mean) / jnp.sqrt(var + eps) * gamma + beta
        return yf.reshape(B, N, F)

    y = gc2(x)
    y = jnp.tanh(bn(y, bn1_gamma, bn1_beta, bn1_mean, bn1_var))
    y = gc2(y)
    y = jnp.tanh(bn(y, bn2_gamma, bn2_beta, bn2_mean, bn2_var))
    return y + x


if __name__ == "__main__":
    B, N, F = 2, 16, 32  # batch, node_n, in_features
    key = jax.random.PRNGKey(0)
    keys = jax.random.split(key, 10)

    stdv = 1.0 / math.sqrt(F)
    x = jax.random.normal(keys[0], (B, N, F), jnp.float32)
    h0 = jax.random.normal(keys[1], (B, N, F), jnp.float32)
    weight = jax.random.uniform(keys[2], (2 * F, F), jnp.float32, -stdv, stdv)
    att = jax.random.uniform(keys[3], (N, N), jnp.float32, -stdv, stdv)
    bias = jax.random.uniform(keys[4], (F,), jnp.float32, -stdv, stdv)

    # BatchNorm1d(N*F) parameters / running stats (deterministic).
    bn1_gamma = jax.random.uniform(keys[5], (N * F,), jnp.float32, 0.5, 1.5)
    bn1_beta = jax.random.uniform(keys[6], (N * F,), jnp.float32, -0.1, 0.1)
    bn1_mean = jnp.zeros((N * F,), jnp.float32)
    bn1_var = jnp.ones((N * F,), jnp.float32)
    bn2_gamma = jax.random.uniform(keys[7], (N * F,), jnp.float32, 0.5, 1.5)
    bn2_beta = jax.random.uniform(keys[8], (N * F,), jnp.float32, -0.1, 0.1)
    bn2_mean = jnp.zeros((N * F,), jnp.float32)
    bn2_var = jnp.ones((N * F,), jnp.float32)

    # ---- one-time parameter folding (hoisted out of the per-call path) ----
    att_c, wb, st = fold_gc_block_params(
        att, weight, bias,
        bn1_gamma, bn1_beta, bn1_mean, bn1_var,
        bn2_gamma, bn2_beta, bn2_mean, bn2_var,
        batch=B, node_n=N, in_features=F)
    jax.block_until_ready((att_c, wb, st))

    fwd = jax.jit(gc_block_forward)
    out = fwd(x, h0, att_c, wb, st)
    jax.block_until_ready(out)

    ref = gc_block_reference(x, h0, att, weight, bias,
                             bn1_gamma, bn1_beta, bn1_mean, bn1_var,
                             bn2_gamma, bn2_beta, bn2_mean, bn2_var)
    assert out.shape == (B, N, F)
    max_err = float(jnp.max(jnp.abs(out - ref)))
    assert jnp.allclose(out, ref, atol=1e-4, rtol=1e-4), max_err

    print("KERNEL_OK")
</pallas_src>

<mosaic_0001>
module attributes {stable_mosaic.version = 11 : i64} {
  func.func @_gc_block_kernel(%arg0: memref<16x128xf32, #tpu.memory_space<vmem>>, %arg1: memref<16x128xf32, #tpu.memory_space<vmem>>, %arg2: memref<16x16xf32, #tpu.memory_space<vmem>>, %arg3: memref<2x128x128xf32, #tpu.memory_space<vmem>>, %arg4: memref<4x16x128xf32, #tpu.memory_space<vmem>>, %arg5: memref<16x128xf32, #tpu.memory_space<vmem>>) attributes {dimension_semantics = [], scalar_prefetch = 0 : i64, scratch_operands = 0 : i64, tpu.core_type = #tpu.core_type<tc>} {
    %c0 = arith.constant 0 : index
    %c0_0 = arith.constant 0 : index
    %0 = vector.load %arg0[%c0, %c0_0] : memref<16x128xf32, #tpu.memory_space<vmem>>, vector<16x128xf32>
    %c0_1 = arith.constant 0 : index
    %c0_2 = arith.constant 0 : index
    %1 = vector.load %arg2[%c0_1, %c0_2] : memref<16x16xf32, #tpu.memory_space<vmem>>, vector<16x16xf32>
    %c0_3 = arith.constant 0 : index
    %c0_4 = arith.constant 0 : index
    %c0_5 = arith.constant 0 : index
    %2 = vector.load %arg3[%c0_3, %c0_4, %c0_5] : memref<2x128x128xf32, #tpu.memory_space<vmem>>, vector<1x128x128xf32>
    %3 = vector.shape_cast %2 : vector<1x128x128xf32> to vector<128x128xf32>
    %c0_6 = arith.constant 0 : index
    %c0_7 = arith.constant 0 : index
    %4 = vector.load %arg1[%c0_6, %c0_7] : memref<16x128xf32, #tpu.memory_space<vmem>>, vector<16x128xf32>
    %c1 = arith.constant 1 : index
    %c0_8 = arith.constant 0 : index
    %c0_9 = arith.constant 0 : index
    %5 = vector.load %arg3[%c1, %c0_8, %c0_9] : memref<2x128x128xf32, #tpu.memory_space<vmem>>, vector<1x128x128xf32>
    %6 = vector.shape_cast %5 : vector<1x128x128xf32> to vector<128x128xf32>
    %cst = arith.constant dense<0.000000e+00> : vector<16x128xf32>
    %7 = tpu.matmul %4, %6, %cst {dimension_numbers = #tpu.dot_dimension_numbers<[1], [0], [0], [1], [0, 0, 1, 1], [], []>} : vector<16x128xf32>, vector<128x128xf32>, vector<16x128xf32> -> vector<16x128xf32>
    %cst_10 = arith.constant dense<0.000000e+00> : vector<16x128xf32>
    %8 = tpu.matmul %1, %0, %cst_10 {dimension_numbers = #tpu.dot_dimension_numbers<[1], [0], [0], [1], [0, 0, 1, 1], [], []>} : vector<16x16xf32>, vector<16x128xf32>, vector<16x128xf32> -> vector<16x128xf32>
    %cst_11 = arith.constant dense<0.000000e+00> : vector<16x128xf32>
    %9 = tpu.matmul %8, %3, %cst_11 {dimension_numbers = #tpu.dot_dimension_numbers<[1], [0], [0], [1], [0, 0, 1, 1], [], []>} : vector<16x128xf32>, vector<128x128xf32>, vector<16x128xf32> -> vector<16x128xf32>
    %10 = arith.addf %9, %7 : vector<16x128xf32>
    %c0_12 = arith.constant 0 : index
    %c0_13 = arith.constant 0 : index
    %c0_14 = arith.constant 0 : index
    %11 = vector.load %arg4[%c0_12, %c0_13, %c0_14] : memref<4x16x128xf32, #tpu.memory_space<vmem>>, vector<1x16x128xf32>
    %12 = vector.shape_cast %11 : vector<1x16x128xf32> to vector<16x128xf32>
    %13 = arith.mulf %10, %12 : vector<16x128xf32>
    %c1_15 = arith.constant 1 : index
    %c0_16 = arith.constant 0 : index
    %c0_17 = arith.constant 0 : index
    %14 = vector.load %arg4[%c1_15, %c0_16, %c0_17] : memref<4x16x128xf32, #tpu.memory_space<vmem>>, vector<1x16x128xf32>
    %15 = vector.shape_cast %14 : vector<1x16x128xf32> to vector<16x128xf32>
    %16 = arith.addf %13, %15 : vector<16x128xf32>
    %17 = math.tanh %16 : vector<16x128xf32>
    %cst_18 = arith.constant dense<0.000000e+00> : vector<16x128xf32>
    %18 = tpu.matmul %1, %17, %cst_18 {dimension_numbers = #tpu.dot_dimension_numbers<[1], [0], [0], [1], [0, 0, 1, 1], [], []>} : vector<16x16xf32>, vector<16x128xf32>, vector<16x128xf32> -> vector<16x128xf32>
    %cst_19 = arith.constant dense<0.000000e+00> : vector<16x128xf32>
    %19 = tpu.matmul %18, %3, %cst_19 {dimension_numbers = #tpu.dot_dimension_numbers<[1], [0], [0], [1], [0, 0, 1, 1], [], []>} : vector<16x128xf32>, vector<128x128xf32>, vector<16x128xf32> -> vector<16x128xf32>
    %20 = arith.addf %19, %7 : vector<16x128xf32>
    %c2 = arith.constant 2 : index
    %c0_20 = arith.constant 0 : index
    %c0_21 = arith.constant 0 : index
    %21 = vector.load %arg4[%c2, %c0_20, %c0_21] : memref<4x16x128xf32, #tpu.memory_space<vmem>>, vector<1x16x128xf32>
    %22 = vector.shape_cast %21 : vector<1x16x128xf32> to vector<16x128xf32>
    %23 = arith.mulf %20, %22 : vector<16x128xf32>
    %c3 = arith.constant 3 : index
    %c0_22 = arith.constant 0 : index
    %c0_23 = arith.constant 0 : index
    %24 = vector.load %arg4[%c3, %c0_22, %c0_23] : memref<4x16x128xf32, #tpu.memory_space<vmem>>, vector<1x16x128xf32>
    %25 = vector.shape_cast %24 : vector<1x16x128xf32> to vector<16x128xf32>
    %26 = arith.addf %23, %25 : vector<16x128xf32>
    %27 = math.tanh %26 : vector<16x128xf32>
    %28 = arith.addf %27, %0 : vector<16x128xf32>
    %c0_24 = arith.constant 0 : index
    %c0_25 = arith.constant 0 : index
    %29 = vector.load %arg5[%c0_24, %c0_25] : memref<16x128xf32, #tpu.memory_space<vmem>>, vector<16x128xf32>
    tpu.vector_store %arg5[%c0_24, %c0_25], %28 {strides = array<i32>} : memref<16x128xf32, #tpu.memory_space<vmem>>, vector<16x128xf32>,
    return
  }
}

</mosaic_0001>

<bundles_post_ra>
// kernel: gc_block_forward.1
= control target key start
LH: loop header
LB: loop body
LE: loop exit
PB: predicated region body
PF: predicated region fallthrough
CT: control target
= control target key end

     0   :  { %10 = vsyncpa [#allocation3], 0  ;;  %s721_s18 = smov [#allocation2]   ;;  %s959_s0 = inlined_call_operand.vmem [shape: f32[16,128], index: 0, kind: input, shape index: {}, may-alias: {0,5}]   ;;  %s960_s1 = inlined_call_operand.vmem [shape: f32[16,128], index: 1, kind: input, shape index: {}]   ;;  %s961_s2 = inlined_call_operand.vmem [shape: f32[16,16], index: 2, kind: input, shape index: {}]   ;;  %s962_s3 = inlined_call_operand.vmem [shape: f32[2,128,128], index: 3, kind: input, shape index: {}]   ;;  %s963_s4 = inlined_call_operand.hbm [shape: f32[4,16,128], index: 4, kind: input, shape index: {}]   ;;  %s964_s5 = inlined_call_operand.vmem [shape: f32[16,128], index: 5, kind: output, shape index: {}, may-alias: {0,5}]  }
   0x1   :  { %s24_s19 = sshll.u32 %s721_s18, 4  ;;  %s25_s19 = int_to_ptr.vmem [resolvable:$true] %s24_s19 }
   0x2   :  { %s707_s20 = scalar_lea.vmem %s25_s19, 1024  ;;  %p712_p1 = scmp.lt.s32.totalorder %s25_s19, %s25_s19 }
   0x3   :  { %p708_p0 = scmp.ne.s32.totalorder %s25_s19, %s707_s20  ;;  %p713_p2 = scmp.lt.s32.totalorder %s707_s20, %s707_s20 }
   0x5   :  { %p714_p3 = por %p713_p2, %p712_p1 }
   0x7   :  { %p715_p4 = pnand %p714_p3, %p708_p0 }
   0x9   :  { %718 = shalt.err (!%p715_p4)
}
   0xa   :  { %s722_s21 = smov 128   ;;  %s723_s22 = smov 8  }
   0xb   :  { %30 = dma.hbm_to_vmem [thread:$0]  %s963_s4, 1024, %s25_s19, [#allocation3], %s722_s21, %s722_s21, %s723_s22  }
   0xc   :  { %719 = dma.done.wait [#allocation3], 1024  }
   0xd   :  { %720 = vsyncadd [#allocation3], 4294966272  ;;  %vm148_vm0 = vcmask 130048   ;;  %v760_v0 = vld [vmem:[%s959_s0 + $0x8] sm:$0xff]  ;;  %v765_v1 = vld [vmem:[%s959_s0] sm:$0xff] }
   0xe   :  { %v770_v2 = vld [vmem:[%s961_s2] sm:$0xff]  ;;  %604 = vmatprep.subr.mxu1 %v760_v0  ;;  %v502_v3 = vld [vmem:[%s962_s3 + $0xf8] sm:$0xff]  ;;  %v501_v4 = vld [vmem:[%s962_s3 + $0xf0] sm:$0xff] }
   0xf   :  { %608 = vmatprep.mubr.msk.f32.mxu1 %vm148_vm0, %v770_v2  ;;  %605 = vmatpush3.msra.mxu1 %v760_v0  ;;  %v785_v5 = vld [vmem:[%s961_s2 + $0x8] sm:$0xff]  ;;  %v790_v6 = vld [vmem:[%s962_s3 + $0x78] sm:$0xff]  ;;  %v800_v8 = vld [vmem:[%s962_s3 + $0x70] sm:$0xff] }
  0x10   :  { %569 = vmatprep.subr.mxu0 %v502_v3  ;;  %606 = vmatprep.subr.mxu1 %v765_v1  ;;  %v500_v7 = vld [vmem:[%s962_s3 + $0xe8] sm:$0xff]  ;;  %v499_v9 = vld [vmem:[%s962_s3 + $0xe0] sm:$0xff]  ;;  %v498_v11 = vld [vmem:[%s962_s3 + $0xd8] sm:$0xff] }
  0x11   :  { %570 = vmatpush3.msra.mxu0 %v502_v3  ;;  %607 = vmatpush3.msra.mxu1 %v765_v1  ;;  %v812_v10 = vld [vmem:[%s962_s3 + $0x68] sm:$0xff]  ;;  %v822_v12 = vld [vmem:[%s962_s3 + $0x60] sm:$0xff]  ;;  %v497_v13 = vld [vmem:[%s962_s3 + $0xd0] sm:$0xff] }
  0x12   :  { %571 = vmatprep.subr.mxu0 %v501_v4  ;;  %609 = vmatmul.mubr.msk.f32.vlgmr.msra.gmra.mxu1 %vm148_vm0, %v785_v5  ;;  %v832_v14 = vld [vmem:[%s962_s3 + $0x58] sm:$0xff]  ;;  %v496_v15 = vld [vmem:[%s962_s3 + $0xc8] sm:$0xff]  ;;  %v842_v16 = vld [vmem:[%s962_s3 + $0x50] sm:$0xff] }
  0x13   :  { %611 = vmatprep.subr.mxu1 %v790_v6  ;;  %572 = vmatpush3.msra.mxu0 %v501_v4  ;;  %v495_v17 = vld [vmem:[%s962_s3 + $0xc0] sm:$0xff]  ;;  %v852_v18 = vld [vmem:[%s962_s3 + $0x48] sm:$0xff]  ;;  %v494_v19 = vld [vmem:[%s962_s3 + $0xb8] sm:$0xff] }
  0x14   :  { %612 = vmatpush3.msra.mxu1 %v790_v6  ;;  %573 = vmatprep.subr.mxu0 %v500_v7  ;;  %v862_v20 = vld [vmem:[%s962_s3 + $0x40] sm:$0xff]  ;;  %v493_v21 = vld [vmem:[%s962_s3 + $0xb0] sm:$0xff]  ;;  %v872_v22 = vld [vmem:[%s962_s3 + $0x38] sm:$0xff] }
  0x15   :  { %613 = vmatprep.subr.mxu1 %v800_v8  ;;  %574 = vmatpush3.msra.mxu0 %v500_v7  ;;  %v492_v23 = vld [vmem:[%s962_s3 + $0xa8] sm:$0xff]  ;;  %v882_v24 = vld [vmem:[%s962_s3 + $0x30] sm:$0xff]  ;;  %v491_v25 = vld [vmem:[%s962_s3 + $0xa0] sm:$0xff] }
  0x16   :  { %614 = vmatpush3.msra.mxu1 %v800_v8  ;;  %575 = vmatprep.subr.mxu0 %v499_v9  ;;  %v43_v26 = vld [vmem:[%s962_s3 + $0x28] sm:$0xff]  ;;  %v490_v27 = vld [vmem:[%s962_s3 + $0x98] sm:$0xff]  ;;  %v42_v28 = vld [vmem:[%s962_s3 + $0x20] sm:$0xff] }
  0x17   :  { %615 = vmatprep.subr.mxu1 %v812_v10  ;;  %576 = vmatpush3.msra.mxu0 %v499_v9  ;;  %v489_v29 = vld [vmem:[%s962_s3 + $0x90] sm:$0xff]  ;;  %v41_v30 = vld [vmem:[%s962_s3 + $0x18] sm:$0xff]  ;;  %v488_v31 = vld [vmem:[%s962_s3 + $0x88] sm:$0xff] }
  0x18   :  { %616 = vmatpush3.msra.mxu1 %v812_v10  ;;  %577 = vmatprep.subr.mxu0 %v498_v11  ;;  %v40_v32 = vld [vmem:[%s962_s3 + $0x10] sm:$0xff]  ;;  %v487_v33 = vld [vmem:[%s962_s3 + $0x80] sm:$0xff]  ;;  %v39_v34 = vld [vmem:[%s962_s3 + $0x8] sm:$0xff] }
  0x19   :  { %617 = vmatprep.subr.mxu1 %v822_v12  ;;  %578 = vmatpush3.msra.mxu0 %v498_v11  ;;  %v54_v35 = vld [vmem:[%s960_s1] sm:$0xff]  ;;  %v55_v36 = vld [vmem:[%s960_s1 + $0x8] sm:$0xff]  ;;  %v311_v45 = vld [vmem:[#allocation2 + $0x18] sm:$0xff] }
  0x1a   :  { %618 = vmatpush3.msra.mxu1 %v822_v12  ;;  %579 = vmatprep.subr.mxu0 %v497_v13  ;;  %v38_v37 = vld [vmem:[%s962_s3] sm:$0xff]  ;;  %v306_v42 = vld [vmem:[#allocation2 + $0x8] sm:$0xff]  ;;  %v310_v50 = vld [vmem:[#allocation2 + $0x10] sm:$0xff] }
  0x1b   :  { %619 = vmatprep.subr.mxu1 %v832_v14  ;;  %580 = vmatpush3.msra.mxu0 %v497_v13  ;;  %v305_v47 = vld [vmem:[#allocation2] sm:$0xff]  ;;  %v468_v59 = vld [vmem:[#allocation2 + $0x28] sm:$0xff]  ;;  %v473_v61 = vld [vmem:[#allocation2 + $0x38] sm:$0xff] }
  0x1c   :  { %620 = vmatpush3.msra.mxu1 %v832_v14  ;;  %581 = vmatprep.subr.mxu0 %v496_v15  ;;  %v467_v63 = vld [vmem:[#allocation2 + $0x20] sm:$0xff]  ;;  %v472_v4 = vld [vmem:[#allocation2 + $0x30] sm:$0xff] }
  0x1d   :  { %621 = vmatprep.subr.mxu1 %v842_v16  ;;  %582 = vmatpush3.msra.mxu0 %v496_v15 }
  0x1e   :  { %622 = vmatpush3.msra.mxu1 %v842_v16  ;;  %583 = vmatprep.subr.mxu0 %v495_v17 }
  0x1f   :  { %623 = vmatprep.subr.mxu1 %v852_v18  ;;  %584 = vmatpush3.msra.mxu0 %v495_v17 }
  0x20   :  { %624 = vmatpush3.msra.mxu1 %v852_v18  ;;  %585 = vmatprep.subr.mxu0 %v494_v19 }
  0x21   :  { %625 = vmatprep.subr.mxu1 %v862_v20  ;;  %586 = vmatpush3.msra.mxu0 %v494_v19 }
  0x22   :  { %626 = vmatpush3.msra.mxu1 %v862_v20  ;;  %587 = vmatprep.subr.mxu0 %v493_v21 }
  0x23   :  { %627 = vmatprep.subr.mxu1 %v872_v22  ;;  %588 = vmatpush3.msra.mxu0 %v493_v21 }
  0x24   :  { %628 = vmatpush3.msra.mxu1 %v872_v22  ;;  %589 = vmatprep.subr.mxu0 %v492_v23 }
  0x25   :  { %629 = vmatprep.subr.mxu1 %v882_v24  ;;  %590 = vmatpush3.msra.mxu0 %v492_v23 }
  0x26   :  { %630 = vmatpush3.msra.mxu1 %v882_v24  ;;  %591 = vmatprep.subr.mxu0 %v491_v25 }
  0x27   :  { %631 = vmatprep.subr.mxu1 %v43_v26  ;;  %592 = vmatpush3.msra.mxu0 %v491_v25 }
  0x28   :  { %632 = vmatpush3.msra.mxu1 %v43_v26  ;;  %593 = vmatprep.subr.mxu0 %v490_v27 }
  0x29   :  { %633 = vmatprep.subr.mxu1 %v42_v28  ;;  %594 = vmatpush3.msra.mxu0 %v490_v27 }
  0x2a   :  { %634 = vmatpush3.msra.mxu1 %v42_v28  ;;  %595 = vmatprep.subr.mxu0 %v489_v29 }
  0x2b   :  { %635 = vmatprep.subr.mxu1 %v41_v30  ;;  %596 = vmatpush3.msra.mxu0 %v489_v29 }
  0x2c   :  { %636 = vmatpush3.msra.mxu1 %v41_v30  ;;  %597 = vmatprep.subr.mxu0 %v488_v31 }
  0x2d   :  { %637 = vmatprep.subr.mxu1 %v40_v32  ;;  %598 = vmatpush3.msra.mxu0 %v488_v31 }
  0x2e   :  { %638 = vmatpush3.msra.mxu1 %v40_v32  ;;  %599 = vmatprep.subr.mxu0 %v487_v33 }
  0x2f   :  { %600 = vmatpush3.msra.mxu0 %v487_v33  ;;  %639 = vmatprep.subr.mxu1 %v39_v34 }
  0x30   :  { %653 = vmatprep.subr.mxu0 %v790_v6  ;;  %601 = vmatprep.mubr.f32.mxu0 %v54_v35 }
  0x31   :  { %640 = vmatpush3.msra.mxu1 %v39_v34  ;;  %602 = vmatmul.mubr.f32.vlgmr.msra.gmra.mxu0 %v55_v36 }
  0x32   :  { %641 = vmatprep.subr.mxu1 %v38_v37  ;;  %654 = vmatpush3.msra.mxu0 %v790_v6 }
  0x33   :  { %642 = vmatpush3.msra.mxu1 %v38_v37  ;;  %655 = vmatprep.subr.mxu0 %v800_v8 }
  0x34   :  { %656 = vmatpush3.msra.mxu0 %v800_v8 }
  0x35   :  { %657 = vmatprep.subr.mxu0 %v812_v10 }
  0x36   :  { %658 = vmatpush3.msra.mxu0 %v812_v10 }
  0x37   :  { %659 = vmatprep.subr.mxu0 %v822_v12 }
  0x38   :  { %660 = vmatpush3.msra.mxu0 %v822_v12 }
  0x39   :  { %661 = vmatprep.subr.mxu0 %v832_v14 }
  0x3a   :  { %662 = vmatpush3.msra.mxu0 %v832_v14 }
  0x3b   :  { %663 = vmatprep.subr.mxu0 %v842_v16 }
  0x3c   :  { %664 = vmatpush3.msra.mxu0 %v842_v16 }
  0x3d   :  { %665 = vmatprep.subr.mxu0 %v852_v18 }
  0x3e   :  { %666 = vmatpush3.msra.mxu0 %v852_v18 }
  0x3f   :  { %667 = vmatprep.subr.mxu0 %v862_v20 }
  0x40   :  { %668 = vmatpush3.msra.mxu0 %v862_v20 }
  0x41   :  { %669 = vmatprep.subr.mxu0 %v872_v22 }
  0x42   :  { %670 = vmatpush3.msra.mxu0 %v872_v22 }
  0x43   :  { %671 = vmatprep.subr.mxu0 %v882_v24 }
  0x44   :  { %672 = vmatpush3.msra.mxu0 %v882_v24 }
  0x45   :  { %673 = vmatprep.subr.mxu0 %v43_v26 }
  0x46   :  { %674 = vmatpush3.msra.mxu0 %v43_v26 }
  0x47   :  { %675 = vmatprep.subr.mxu0 %v42_v28 }
  0x48   :  { %676 = vmatpush3.msra.mxu0 %v42_v28 }
  0x49   :  { %677 = vmatprep.subr.mxu0 %v41_v30 }
  0x4a   :  { %678 = vmatpush3.msra.mxu0 %v41_v30 }
  0x4b   :  { %679 = vmatprep.subr.mxu0 %v40_v32 }
  0x4c   :  { %680 = vmatpush3.msra.mxu0 %v40_v32 }
  0x4d   :  { %681 = vmatprep.subr.mxu0 %v39_v34 }
  0x4e   :  { %682 = vmatpush3.msra.mxu0 %v39_v34 }
  0x4f   :  { %683 = vmatprep.subr.mxu0 %v38_v37 }
  0x50   :  { %684 = vmatpush3.msra.mxu0 %v38_v37 }
  0xd2   :  { %v610_v38 = vpop.f32.mrf.mxu1 }
  0xd4   :  { %v221_v39 = vpop.f32.mrf.mxu1 }
  0xd5   :  { %643 = vmatprep.mubr.f32.mxu1 %v221_v39 }
  0xd6   :  { %644 = vmatmul.mubr.f32.vlgmr.msra.gmra.mxu1 %v610_v38 }
  0xd7   :  { %650 = vmatprep.mubr.msk.f32.mxu1 %vm148_vm0, %v770_v2 }
  0xf1   :  { %v603_v40 = vpop.f32.mrf.mxu0 }
  0xf3   :  { %v139_v44 = vpop.f32.mrf.mxu0 }
 0x196   :  { %v645_v41 = vpop.f32.mrf.mxu1 }
 0x197   :  { %v302_v43 = vadd.f32 %v645_v41, %v603_v40 }
 0x198   :  { %v296_v46 = vpop.f32.mrf.mxu1 }
 0x199   :  { %v308_v48 = vmul.f32 %v306_v42, %v302_v43  ;;  %v297_v49 = vadd.f32 %v296_v46, %v139_v44 }
 0x19b   :  { %v313_v51 = vadd.f32 %v311_v45, %v308_v48  ;;  %v307_v52 = vmul.f32 %v305_v47, %v297_v49 }
 0x19d   :  { %691 = vtanh.f32 %v313_v51  ;;  %v312_v53 = vadd.f32 %v310_v50, %v307_v52 }
 0x19f   :  { %693 = vtanh.f32 %v312_v53 }
 0x1aa   :  { %v692_v54 = vpop.eup %691 }
 0x1ab   :  { %646 = vmatprep.subr.mxu1 %v692_v54 }
 0x1ac   :  { %v694_v55 = vpop.eup %693  ;;  %647 = vmatpush3.msra.mxu1 %v692_v54 }
 0x1ad   :  { %648 = vmatprep.subr.mxu1 %v694_v55 }
 0x1ae   :  { %649 = vmatpush3.msra.mxu1 %v694_v55 }
 0x1af   :  { %651 = vmatmul.mubr.msk.f32.vlgmr.msra.gmra.mxu1 %vm148_vm0, %v785_v5 }
 0x26f   :  { %v652_v56 = vpop.f32.mrf.mxu1 }
 0x271   :  { %v382_v57 = vpop.f32.mrf.mxu1 }
 0x272   :  { %685 = vmatprep.mubr.f32.mxu0 %v382_v57 }
 0x273   :  { %686 = vmatmul.mubr.f32.vlgmr.msra.gmra.mxu0 %v652_v56 }
 0x333   :  { %v687_v58 = vpop.f32.mrf.mxu0 }
 0x334   :  { %v463_v60 = vadd.f32 %v687_v58, %v603_v40 }
 0x335   :  { %v457_v62 = vpop.f32.mrf.mxu0 }
 0x336   :  { %v470_v2 = vmul.f32 %v468_v59, %v463_v60  ;;  %v458_v3 = vadd.f32 %v457_v62, %v139_v44 }
 0x338   :  { %v475_v6 = vadd.f32 %v473_v61, %v470_v2  ;;  %v469_v7 = vmul.f32 %v467_v63, %v458_v3 }
 0x33a   :  { %695 = vtanh.f32 %v475_v6  ;;  %v474_v8 = vadd.f32 %v472_v4, %v469_v7 }
 0x33c   :  { %697 = vtanh.f32 %v474_v8 }
 0x347   :  { %v696_v9 = vpop.eup %695 }
 0x348   :  { %v479_v5 = vadd.f32 %v696_v9, %v760_v0 }
 0x349   :  { %v698_v10 = vpop.eup %697 }
 0x34a   :  { %481 = vst [vmem:[%s964_s5 + $0x8] sm:$0xff] %v479_v5  ;;  %v478_v11 = vadd.f32 %v698_v10, %v765_v1 }
 0x34c   :  { %480 = vst [vmem:[%s964_s5] sm:$0xff] %v478_v11 }
 0x34d   :  { %486 = vsyncpa [#allocation3], 1 }

</bundles_post_ra>
